<compile_context>
chip_gen: v7x
topology: tpu7x:2x2x1
jax: 0.10.0
libtpu: 0.0.40
codegen_flags: <defaults>
</compile_context>

<pallas_src>
import functools

import jax
import jax.numpy as jnp
from jax.experimental import pallas as pl
from jax.experimental.pallas import tpu as pltpu


def _round_up(x: int, m: int) -> int:
    return ((x + m - 1) // m) * m


def _pick_tile(dim: int, target: int, align: int) -> int:
    """Largest power-of-2*align tile <= target that keeps padding waste small."""
    dim_a = _round_up(max(dim, 1), align)
    candidates = []
    t = align
    while t <= target:
        candidates.append(t)
        t *= 2
    padded = {t: _round_up(dim_a, t) for t in candidates}
    min_pad = min(padded.values())
    best = align
    for t in candidates:
        if padded[t] * 8 <= min_pad * 9:  # allow <= 12.5% extra padding for a bigger tile
            best = t
    return best


def _chip_config():
    """Per-generation tile targets / VMEM limit.  Conservative (v7x-safe) fallback."""
    kind = ""
    try:
        kind = jax.devices()[0].device_kind.lower()
    except Exception:  # pragma: no cover
        pass
    if "v7" in kind:
        # 64 MiB physical VMEM, 2 TensorCores, 3.2 TB/s HBM: fit VMEM, guarantee 2-way split.
        return dict(tm=512, tn=512, tk=1024, vmem=52 * 1024 * 1024, two_core=True)
    if "v6" in kind:
        # 128 MiB VMEM, 1.4 TB/s HBM: go big to cut re-reads.
        return dict(tm=512, tn=1024, tk=2048, vmem=96 * 1024 * 1024, two_core=False)
    if "v5" in kind:
        # v5e: single vst slot -> amortize accumulator writeback with the largest tk.
        return dict(tm=512, tn=512, tk=2048, vmem=96 * 1024 * 1024, two_core=False)
    return dict(tm=512, tn=512, tk=1024, vmem=48 * 1024 * 1024, two_core=False)


def swishglu_kernel(x_ref, wp_ref, wg_ref, b_ref, o_ref, accp_ref, accg_ref):
    k = pl.program_id(2)
    nk = pl.num_programs(2)

    x = x_ref[...]  # bf16 tile
    pp = jnp.dot(x, wp_ref[...], preferred_element_type=jnp.float32)
    gg = jnp.dot(x, wg_ref[...], preferred_element_type=jnp.float32)

    @pl.when(k == 0)
    def _():
        # Write directly: no zero-fill + re-read of the accumulators.
        accp_ref[...] = pp
        accg_ref[...] = gg

    @pl.when(k > 0)
    def _():
        accp_ref[...] += pp
        accg_ref[...] += gg

    @pl.when(k == nk - 1)
    def _():
        bp = b_ref[0:1, :].astype(jnp.float32)   # proj bias row
        bg = b_ref[1:2, :].astype(jnp.float32)   # gate bias row
        proj = accp_ref[...] + bp
        gate = accg_ref[...] + bg
        o_ref[...] = (proj * (gate * jax.nn.sigmoid(gate))).astype(o_ref.dtype)


def _swishglu_2d(x2d, w_fused, b_stacked, *, n_pad, tm, tn, tk, out_dtype, vmem_limit):
    """x2d: (M_p, K_p) bf16; w_fused: (K_p, 2*N_p) bf16 = [W_proj | W_gate];
    b_stacked: (2, N_p) f32 (row 0 = proj bias, row 1 = gate bias)."""
    M_p, K_p = x2d.shape
    N_p = n_pad
    gm, gn, gk = M_p // tm, N_p // tn, K_p // tk
    n_blocks = N_p // tn  # column-block offset of the gate half inside w_fused

    cost = pl.CostEstimate(
        flops=2 * M_p * (2 * N_p) * K_p,
        transcendentals=M_p * N_p,
        bytes_accessed=(
            gn * M_p * K_p * x2d.dtype.itemsize            # x re-read per N tile
            + gm * K_p * 2 * N_p * w_fused.dtype.itemsize  # W re-read per M tile
            + gm * gn * 2 * N_p * b_stacked.dtype.itemsize
            + M_p * N_p * jnp.dtype(out_dtype).itemsize
        ),
    )

    return pl.pallas_call(
        swishglu_kernel,
        out_shape=jax.ShapeDtypeStruct((M_p, N_p), out_dtype),
        grid_spec=pltpu.PrefetchScalarGridSpec(
            num_scalar_prefetch=0,
            grid=(gm, gn, gk),
            in_specs=[
                pl.BlockSpec((tm, tk), lambda i, j, k: (i, k)),             # x tile
                pl.BlockSpec((tk, tn), lambda i, j, k: (k, j)),             # W_proj half
                pl.BlockSpec((tk, tn), lambda i, j, k: (k, j + n_blocks)),  # W_gate half
                pl.BlockSpec((2, tn), lambda i, j, k: (0, j)),              # bias [proj; gate]
            ],
            out_specs=pl.BlockSpec((tm, tn), lambda i, j, k: (i, j)),
            scratch_shapes=[pltpu.VMEM((tm, tn), jnp.float32),
                            pltpu.VMEM((tm, tn), jnp.float32)],
        ),
        compiler_params=pltpu.CompilerParams(
            dimension_semantics=("parallel", "parallel", "arbitrary"),
            vmem_limit_bytes=vmem_limit,
        ),
        cost_estimate=cost,
    )(x2d, w_fused, w_fused, b_stacked)


def prepare_swishglu_params(w_full, b_full, cfg=None):
    """One-time parameter prepack (pad + bf16 cast).  Do NOT call per forward.

    w_full: (in_dim, 2*out_dim) — already (in, out) layout vs. torch's (out, in);
    b_full: (2*out_dim,)
    """
    cfg = cfg or _chip_config()
    in_dim, two_out = w_full.shape
    out_dim = two_out // 2

    tk = _pick_tile(in_dim, cfg["tk"], 128)
    tn = _pick_tile(out_dim, cfg["tn"], 128)
    K_p = _round_up(in_dim, tk)
    N_p = _round_up(out_dim, tn)

    # v7x megacore: guarantee >= 2 parallel blocks along N when out_dim allows.
    if cfg["two_core"] and N_p // tn == 1 and N_p >= 256:
        t = (N_p // 2) // 128 * 128
        while t >= 128 and N_p % t != 0:
            t -= 128
        if t >= 128:
            tn = t

    w_proj = w_full[:, :out_dim]
    w_gate = w_full[:, out_dim:]
    if (K_p, N_p) != (in_dim, out_dim):
        w_proj = jnp.pad(w_proj, ((0, K_p - in_dim), (0, N_p - out_dim)))
        w_gate = jnp.pad(w_gate, ((0, K_p - in_dim), (0, N_p - out_dim)))
    w_fused = jnp.concatenate([w_proj, w_gate], axis=1).astype(jnp.bfloat16)

    b_proj = jnp.pad(b_full[:out_dim], (0, N_p - out_dim))
    b_gate = jnp.pad(b_full[out_dim:], (0, N_p - out_dim))
    b_stacked = jnp.stack([b_proj, b_gate]).astype(jnp.float32)  # (2, N_p)

    return dict(w_fused=w_fused, b_stacked=b_stacked, in_dim=in_dim,
                out_dim=out_dim, K_p=K_p, N_p=N_p, tn=tn, tk=tk, cfg=cfg)


def swishglu_forward(x, params):
    """Equivalent of SwishGLU.forward for arbitrary leading dims."""
    cfg = params["cfg"]
    in_dim, out_dim = params["in_dim"], params["out_dim"]
    K_p, N_p = params["K_p"], params["N_p"]
    tn, tk = params["tn"], params["tk"]

    lead = x.shape[:-1]
    x2d = x.reshape(-1, in_dim)
    M = x2d.shape[0]
    out_dtype = x.dtype

    # tm rounded to a multiple of 16 (bf16 sublane packing), padding-waste aware.
    tm = _pick_tile(M, cfg["tm"], 16)
    M_p = _round_up(M, tm)

    x_bf = x2d.astype(jnp.bfloat16)
    if (M_p, K_p) != (M, in_dim):
        x_bf = jnp.pad(x_bf, ((0, M_p - M), (0, K_p - in_dim)))

    y2d = _swishglu_2d(x_bf, params["w_fused"], params["b_stacked"],
                       n_pad=N_p, tm=tm, tn=tn, tk=tk,
                       out_dtype=out_dtype, vmem_limit=cfg["vmem"])
    y2d = y2d[:M, :out_dim]
    return y2d.reshape(*lead, out_dim)


if __name__ == "__main__":
    key = jax.random.PRNGKey(0)
    k_x, k_w, k_b = jax.random.split(key, 3)

    batch, seq, in_dim, out_dim = 2, 8, 32, 32
    x = jax.random.normal(k_x, (batch, seq, in_dim), dtype=jnp.float32)

    # Deterministic synthetic parameters (torch Linear init is U(-1/sqrt(in), 1/sqrt(in)))
    bound = 1.0 / jnp.sqrt(jnp.float32(in_dim))
    w_full = jax.random.uniform(k_w, (in_dim, 2 * out_dim), jnp.float32, -bound, bound)
    b_full = jax.random.uniform(k_b, (2 * out_dim,), jnp.float32, -bound, bound)

    params = prepare_swishglu_params(w_full, b_full)   # one-time prepack
    fwd = jax.jit(functools.partial(swishglu_forward, params=params))

    y = jax.block_until_ready(fwd(x))

    # Pure-JAX f32 reference of the same forward semantics (kernel uses bf16
    # MXU operands with f32 accumulation, hence the loosened tolerance).
    full = x @ w_full + b_full
    proj_ref, gate_ref = jnp.split(full, 2, axis=-1)
    y_ref = proj_ref * (gate_ref * jax.nn.sigmoid(gate_ref))

    assert y.shape == (batch, seq, out_dim)
    assert jnp.allclose(y, y_ref, atol=2e-2, rtol=2e-2), float(jnp.max(jnp.abs(y - y_ref)))

    print("KERNEL_OK")
</pallas_src>

<mosaic_0001>
module attributes {stable_mosaic.version = 11 : i64} {
  func.func @swishglu_kernel(%arg0: i32, %arg1: i32, %arg2: i32, %arg3: memref<16x128xbf16, #tpu.memory_space<vmem>>, %arg4: memref<128x128xbf16, #tpu.memory_space<vmem>>, %arg5: memref<128x128xbf16, #tpu.memory_space<vmem>>, %arg6: memref<2x128xf32, #tpu.memory_space<vmem>>, %arg7: memref<16x128xf32, #tpu.memory_space<vmem>>, %arg8: memref<16x128xf32, #tpu.memory_space<vmem>>, %arg9: memref<16x128xf32, #tpu.memory_space<vmem>>) attributes {dimension_semantics = [#tpu.dimension_semantics<parallel>, #tpu.dimension_semantics<parallel>, #tpu.dimension_semantics<arbitrary>], iteration_bounds = array<i64: 1, 1, 1>, scalar_prefetch = 0 : i64, scratch_operands = 2 : i64, tpu.core_type = #tpu.core_type<tc>, window_params = [{transform_indices = @transform_0, window_bounds = array<i64: 16, 128>}, {transform_indices = @transform_1, window_bounds = array<i64: 128, 128>}, {transform_indices = @transform_2, window_bounds = array<i64: 128, 128>}, {transform_indices = @transform_3, window_bounds = array<i64: 2, 128>}, {transform_indices = @transform_4, window_bounds = array<i64: 16, 128>}]} {
    %c0 = arith.constant 0 : index
    %c0_0 = arith.constant 0 : index
    %0 = vector.load %arg3[%c0, %c0_0] : memref<16x128xbf16, #tpu.memory_space<vmem>>, vector<16x128xbf16>
    %c0_1 = arith.constant 0 : index
    %c0_2 = arith.constant 0 : index
    %1 = vector.load %arg4[%c0_1, %c0_2] : memref<128x128xbf16, #tpu.memory_space<vmem>>, vector<128x128xbf16>
    %cst = arith.constant dense<0.000000e+00> : vector<16x128xf32>
    %2 = tpu.matmul %0, %1, %cst {dimension_numbers = #tpu.dot_dimension_numbers<[1], [0], [0], [1], [0, 0, 1, 1], [], []>} : vector<16x128xbf16>, vector<128x128xbf16>, vector<16x128xf32> -> vector<16x128xf32>
    %c0_3 = arith.constant 0 : index
    %c0_4 = arith.constant 0 : index
    %3 = vector.load %arg5[%c0_3, %c0_4] : memref<128x128xbf16, #tpu.memory_space<vmem>>, vector<128x128xbf16>
    %cst_5 = arith.constant dense<0.000000e+00> : vector<16x128xf32>
    %4 = tpu.matmul %0, %3, %cst_5 {dimension_numbers = #tpu.dot_dimension_numbers<[1], [0], [0], [1], [0, 0, 1, 1], [], []>} : vector<16x128xbf16>, vector<128x128xbf16>, vector<16x128xf32> -> vector<16x128xf32>
    %c0_i32 = arith.constant 0 : i32
    %5 = arith.cmpi eq, %arg2, %c0_i32 : i32
    %6 = arith.extui %5 : i1 to i32
    %c0_i32_6 = arith.constant 0 : i32
    %7 = arith.cmpi ne, %6, %c0_i32_6 : i32
    scf.if %7 {
      %c0_11 = arith.constant 0 : index
      %c0_12 = arith.constant 0 : index
      %14 = vector.load %arg8[%c0_11, %c0_12] : memref<16x128xf32, #tpu.memory_space<vmem>>, vector<16x128xf32>
      tpu.vector_store %arg8[%c0_11, %c0_12], %2 {strides = array<i32>} : memref<16x128xf32, #tpu.memory_space<vmem>>, vector<16x128xf32>,
      %c0_13 = arith.constant 0 : index
      %c0_14 = arith.constant 0 : index
      %15 = vector.load %arg9[%c0_13, %c0_14] : memref<16x128xf32, #tpu.memory_space<vmem>>, vector<16x128xf32>
      tpu.vector_store %arg9[%c0_13, %c0_14], %4 {strides = array<i32>} : memref<16x128xf32, #tpu.memory_space<vmem>>, vector<16x128xf32>,
    } else {
    }
    %c0_i32_7 = arith.constant 0 : i32
    %8 = arith.cmpi sgt, %arg2, %c0_i32_7 : i32
    %9 = arith.extui %8 : i1 to i32
    %c0_i32_8 = arith.constant 0 : i32
    %10 = arith.cmpi ne, %9, %c0_i32_8 : i32
    scf.if %10 {
      %c0_11 = arith.constant 0 : index
      %c0_12 = arith.constant 0 : index
      %14 = vector.load %arg8[%c0_11, %c0_12] : memref<16x128xf32, #tpu.memory_space<vmem>>, vector<16x128xf32>
      %15 = arith.addf %14, %2 : vector<16x128xf32>
      %c0_13 = arith.constant 0 : index
      %c0_14 = arith.constant 0 : index
      %16 = vector.load %arg8[%c0_13, %c0_14] : memref<16x128xf32, #tpu.memory_space<vmem>>, vector<16x128xf32>
      tpu.vector_store %arg8[%c0_13, %c0_14], %15 {strides = array<i32>} : memref<16x128xf32, #tpu.memory_space<vmem>>, vector<16x128xf32>,
      %c0_15 = arith.constant 0 : index
      %c0_16 = arith.constant 0 : index
      %17 = vector.load %arg9[%c0_15, %c0_16] : memref<16x128xf32, #tpu.memory_space<vmem>>, vector<16x128xf32>
      %18 = arith.addf %17, %4 : vector<16x128xf32>
      %c0_17 = arith.constant 0 : index
      %c0_18 = arith.constant 0 : index
      %19 = vector.load %arg9[%c0_17, %c0_18] : memref<16x128xf32, #tpu.memory_space<vmem>>, vector<16x128xf32>
      tpu.vector_store %arg9[%c0_17, %c0_18], %18 {strides = array<i32>} : memref<16x128xf32, #tpu.memory_space<vmem>>, vector<16x128xf32>,
    } else {
    }
    %c0_i32_9 = arith.constant 0 : i32
    %11 = arith.cmpi eq, %arg2, %c0_i32_9 : i32
    %12 = arith.extui %11 : i1 to i32
    %c0_i32_10 = arith.constant 0 : i32
    %13 = arith.cmpi ne, %12, %c0_i32_10 : i32
    scf.if %13 {
      %c0_11 = arith.constant 0 : index
      %c0_12 = arith.constant 0 : index
      %14 = vector.load %arg6[%c0_11, %c0_12] : memref<2x128xf32, #tpu.memory_space<vmem>>, vector<1x128xf32>
      %c1 = arith.constant 1 : index
      %c0_13 = arith.constant 0 : index
      %15 = vector.load %arg6[%c1, %c0_13] : memref<2x128xf32, #tpu.memory_space<vmem>>, vector<1x128xf32>
      %c0_14 = arith.constant 0 : index
      %c0_15 = arith.constant 0 : index
      %16 = vector.load %arg8[%c0_14, %c0_15] : memref<16x128xf32, #tpu.memory_space<vmem>>, vector<16x128xf32>
      %17 = vector.broadcast %14 : vector<1x128xf32> to vector<16x128xf32>
      %18 = arith.addf %16, %17 : vector<16x128xf32>
      %c0_16 = arith.constant 0 : index
      %c0_17 = arith.constant 0 : index
      %19 = vector.load %arg9[%c0_16, %c0_17] : memref<16x128xf32, #tpu.memory_space<vmem>>, vector<16x128xf32>
      %20 = vector.broadcast %15 : vector<1x128xf32> to vector<16x128xf32>
      %21 = arith.addf %19, %20 : vector<16x128xf32>
      %22 = arith.negf %21 : vector<16x128xf32>
      %23 = math.exp %22 : vector<16x128xf32>
      %cst_18 = arith.constant 1.000000e+00 : f32
      %24 = vector.broadcast %cst_18 : f32 to vector<16x128xf32>
      %25 = arith.addf %24, %23 : vector<16x128xf32>
      %26 = arith.divf %24, %25 : vector<16x128xf32>
      %27 = arith.mulf %21, %26 : vector<16x128xf32>
      %28 = arith.mulf %18, %27 : vector<16x128xf32>
      %c0_19 = arith.constant 0 : index
      %c0_20 = arith.constant 0 : index
      %29 = vector.load %arg7[%c0_19, %c0_20] : memref<16x128xf32, #tpu.memory_space<vmem>>, vector<16x128xf32>
      tpu.vector_store %arg7[%c0_19, %c0_20], %28 {strides = array<i32>} : memref<16x128xf32, #tpu.memory_space<vmem>>, vector<16x128xf32>,
    } else {
    }
    return
  }
  func.func @transform_0(%arg0: i32, %arg1: i32, %arg2: i32) -> (i32, i32) {
    %c0_i32 = arith.constant 0 : i32
    return %arg0, %arg2 : i32, i32
  }
  func.func @transform_1(%arg0: i32, %arg1: i32, %arg2: i32) -> (i32, i32) {
    %c0_i32 = arith.constant 0 : i32
    return %arg2, %arg1 : i32, i32
  }
  func.func @transform_2(%arg0: i32, %arg1: i32, %arg2: i32) -> (i32, i32) {
    %c1_i32 = arith.constant 1 : i32
    %0 = arith.addi %arg1, %c1_i32 : i32
    %c0_i32 = arith.constant 0 : i32
    return %arg2, %0 : i32, i32
  }
  func.func @transform_3(%arg0: i32, %arg1: i32, %arg2: i32) -> (i32, i32) {
    %c0_i32 = arith.constant 0 : i32
    %c0_i32_0 = arith.constant 0 : i32
    return %c0_i32, %arg1 : i32, i32
  }
  func.func @transform_4(%arg0: i32, %arg1: i32, %arg2: i32) -> (i32, i32) {
    %c0_i32 = arith.constant 0 : i32
    return %arg0, %arg1 : i32, i32
  }
}

</mosaic_0001>

<bundles_post_ra>
// kernel: swishglu_forward.1
= control target key start
LH: loop header
LB: loop body
LE: loop exit
PB: predicated region body
PF: predicated region fallthrough
CT: control target
= control target key end

     0   :  { %v640_v2 = vmov 0.0   ;;  %vm641_vm0 = vmmov 0   ;;  %s796_s0 = inlined_call_operand.vmem [shape: bf16[16,128], index: 0, kind: input, shape index: {}]   ;;  %s797_s1 = inlined_call_operand.vmem [shape: bf16[128,256], index: 1, kind: input, shape index: {}, may-alias: {1,2}]   ;;  %s798_s2 = inlined_call_operand.vmem [shape: bf16[128,256], index: 2, kind: input, shape index: {}, may-alias: {1,2}]   ;;  %s799_s3 = inlined_call_operand.vmem [shape: f32[2,128], index: 3, kind: input, shape index: {}]   ;;  %s800_s4 = inlined_call_operand.vmem [shape: f32[16,128], index: 4, kind: output, shape index: {}]  }
   0x1   :  { %v518_v0 = vld [vmem:[%s798_s2 + $0x4] sm:$0xf]  ;;  %v519_v1 = vld [vmem:[%s798_s2 + $0xc] sm:$0xf]  ;;  %593 = vmatprep.subr.bf16.mxu1 %v640_v2  ;;  %v520_v3 = vld [vmem:[%s798_s2 + $0x14] sm:$0xf]  ;;  %573 = vmatprep.subr.bf16.mxu0 %v640_v2 }
   0x2   :  { %133 = vst [vmem:[#allocation5] sm:$0xf] %v518_v0  ;;  %135 = vst [vmem:[#allocation5 + $0x4] sm:$0xf] %v519_v1  ;;  %v521_v4 = vld [vmem:[%s798_s2 + $0x1c] sm:$0xf]  ;;  %609 = vmatprep.mubr.msk.bf16.mxu1 %vm641_vm0, %v640_v2  ;;  %589 = vmatprep.mubr.msk.bf16.mxu0 %vm641_vm0, %v640_v2 }
   0x3   :  { %v522_v5 = vld [vmem:[%s798_s2 + $0x24] sm:$0xf]  ;;  %137 = vst [vmem:[#allocation5 + $0x8] sm:$0xf] %v520_v3  ;;  %139 = vst [vmem:[#allocation5 + $0xc] sm:$0xf] %v521_v4 }
   0x4   :  { %141 = vst [vmem:[#allocation5 + $0x10] sm:$0xf] %v522_v5  ;;  %v523_v6 = vld [vmem:[%s798_s2 + $0x2c] sm:$0xf]  ;;  %v524_v7 = vld [vmem:[%s798_s2 + $0x34] sm:$0xf] }
   0x5   :  { %v525_v8 = vld [vmem:[%s798_s2 + $0x3c] sm:$0xf]  ;;  %143 = vst [vmem:[#allocation5 + $0x14] sm:$0xf] %v523_v6  ;;  %145 = vst [vmem:[#allocation5 + $0x18] sm:$0xf] %v524_v7 }
   0x6   :  { %147 = vst [vmem:[#allocation5 + $0x1c] sm:$0xf] %v525_v8  ;;  %v526_v9 = vld [vmem:[%s798_s2 + $0x44] sm:$0xf]  ;;  %v527_v10 = vld [vmem:[%s798_s2 + $0x4c] sm:$0xf] }
   0x7   :  { %v528_v11 = vld [vmem:[%s798_s2 + $0x54] sm:$0xf]  ;;  %149 = vst [vmem:[#allocation5 + $0x20] sm:$0xf] %v526_v9  ;;  %151 = vst [vmem:[#allocation5 + $0x24] sm:$0xf] %v527_v10 }
   0x8   :  { %153 = vst [vmem:[#allocation5 + $0x28] sm:$0xf] %v528_v11  ;;  %v529_v12 = vld [vmem:[%s798_s2 + $0x5c] sm:$0xf]  ;;  %v530_v13 = vld [vmem:[%s798_s2 + $0x64] sm:$0xf] }
   0x9   :  { %v531_v14 = vld [vmem:[%s798_s2 + $0x6c] sm:$0xf]  ;;  %155 = vst [vmem:[#allocation5 + $0x2c] sm:$0xf] %v529_v12  ;;  %157 = vst [vmem:[#allocation5 + $0x30] sm:$0xf] %v530_v13 }
   0xa   :  { %159 = vst [vmem:[#allocation5 + $0x34] sm:$0xf] %v531_v14  ;;  %v28_v15 = vld [vmem:[%s797_s1] sm:$0xf]  ;;  %v30_v16 = vld [vmem:[%s797_s1 + $0x8] sm:$0xf] }
   0xb   :  { %v532_v17 = vld [vmem:[%s798_s2 + $0x74] sm:$0xf]  ;;  %29 = vst [vmem:[#allocation4] sm:$0xf] %v28_v15  ;;  %31 = vst [vmem:[#allocation4 + $0x4] sm:$0xf] %v30_v16 }
   0xc   :  { %161 = vst [vmem:[#allocation5 + $0x38] sm:$0xf] %v532_v17  ;;  %v533_v18 = vld [vmem:[%s798_s2 + $0x7c] sm:$0xf]  ;;  %v32_v19 = vld [vmem:[%s797_s1 + $0x10] sm:$0xf] }
   0xd   :  { %v34_v20 = vld [vmem:[%s797_s1 + $0x18] sm:$0xf]  ;;  %163 = vst [vmem:[#allocation5 + $0x3c] sm:$0xf] %v533_v18  ;;  %33 = vst [vmem:[#allocation4 + $0x8] sm:$0xf] %v32_v19 }
   0xe   :  { %35 = vst [vmem:[#allocation4 + $0xc] sm:$0xf] %v34_v20  ;;  %v615_v21 = vld [vmem:[#allocation5] sm:$0xff]   ;;  %v616_v22 = vld [vmem:[#allocation5 + $0x8] sm:$0xff]   ;;  %v617_v23 = vld [vmem:[#allocation5 + $0x10] sm:$0xff]  }
   0xf   :  { %594 = vmatpush3.bf16.msra.mxu1 %v615_v21  ;;  %v618_v25 = vld [vmem:[#allocation5 + $0x18] sm:$0xff]   ;;  %v36_v27 = vld [vmem:[%s797_s1 + $0x20] sm:$0xf]  ;;  %v38_v28 = vld [vmem:[%s797_s1 + $0x28] sm:$0xf] }
  0x10   :  { %595 = vmatprep.subr.bf16.mxu1 %v640_v2  ;;  %v40_v29 = vld [vmem:[%s797_s1 + $0x30] sm:$0xf]  ;;  %37 = vst [vmem:[#allocation4 + $0x10] sm:$0xf] %v36_v27  ;;  %39 = vst [vmem:[#allocation4 + $0x14] sm:$0xf] %v38_v28 }
  0x11   :  { %41 = vst [vmem:[#allocation4 + $0x18] sm:$0xf] %v40_v29  ;;  %v42_v30 = vld [vmem:[%s797_s1 + $0x38] sm:$0xf]  ;;  %v44_v31 = vld [vmem:[%s797_s1 + $0x40] sm:$0xf] }
  0x12   :  { %v622_v24 = vld [vmem:[#allocation4] sm:$0xff]   ;;  %v46_v32 = vld [vmem:[%s797_s1 + $0x48] sm:$0xf]  ;;  %43 = vst [vmem:[#allocation4 + $0x1c] sm:$0xf] %v42_v30  ;;  %v621_v43 = vld [vmem:[#allocation5 + $0x30] sm:$0xff]  }
  0x13   :  { %596 = vmatpush3.bf16.msra.mxu1 %v616_v22  ;;  %574 = vmatpush3.bf16.msra.mxu0 %v622_v24  ;;  %45 = vst [vmem:[#allocation4 + $0x20] sm:$0xf] %v44_v31  ;;  %47 = vst [vmem:[#allocation4 + $0x24] sm:$0xf] %v46_v32  ;;  %v48_v33 = vld [vmem:[%s797_s1 + $0x50] sm:$0xf] }
  0x14   :  { %597 = vmatprep.subr.bf16.mxu1 %v640_v2  ;;  %575 = vmatprep.subr.bf16.mxu0 %v640_v2  ;;  %v50_v34 = vld [vmem:[%s797_s1 + $0x58] sm:$0xf]  ;;  %v52_v35 = vld [vmem:[%s797_s1 + $0x60] sm:$0xf]  ;;  %49 = vst [vmem:[#allocation4 + $0x28] sm:$0xf] %v48_v33 }
  0x15   :  { %v624_v26 = vld [vmem:[#allocation4 + $0x8] sm:$0xff]   ;;  %51 = vst [vmem:[#allocation4 + $0x2c] sm:$0xf] %v50_v34  ;;  %53 = vst [vmem:[#allocation4 + $0x30] sm:$0xf] %v52_v35  ;;  %v619_v39 = vld [vmem:[#allocation5 + $0x20] sm:$0xff]  }
  0x16   :  { %v54_v36 = vld [vmem:[%s797_s1 + $0x68] sm:$0xf]  ;;  %v56_v37 = vld [vmem:[%s797_s1 + $0x70] sm:$0xf]  ;;  %v58_v38 = vld [vmem:[%s797_s1 + $0x78] sm:$0xf] }
  0x17   :  { %598 = vmatpush3.bf16.msra.mxu1 %v617_v23  ;;  %576 = vmatpush3.bf16.msra.mxu0 %v624_v26  ;;  %55 = vst [vmem:[#allocation4 + $0x34] sm:$0xf] %v54_v36  ;;  %57 = vst [vmem:[#allocation4 + $0x38] sm:$0xf] %v56_v37  ;;  %v620_v40 = vld [vmem:[#allocation5 + $0x28] sm:$0xff]   ;;  %v626_v41 = vld [vmem:[#allocation4 + $0x10] sm:$0xff]  }
  0x18   :  { %599 = vmatprep.subr.bf16.mxu1 %v640_v2  ;;  %577 = vmatprep.subr.bf16.mxu0 %v640_v2  ;;  %59 = vst [vmem:[#allocation4 + $0x3c] sm:$0xf] %v58_v38  ;;  %v623_v45 = vld [vmem:[#allocation5 + $0x38] sm:$0xff]   ;;  %v625_v47 = vld [vmem:[%s796_s0] sm:$0xff]  }
  0x19   :  { %v627_v42 = vld [vmem:[#allocation4 + $0x18] sm:$0xff]   ;;  %v552_v50 = vld [vmem:[%s799_s3 + $0x1] ss:$0 sm:$0xff]  ;;  %v551_v3 = vld [vmem:[%s799_s3] ss:$0 sm:$0xff] }
  0x1a   :  { %v628_v44 = vld [vmem:[#allocation4 + $0x20] sm:$0xff]  }
  0x1b   :  { %600 = vmatpush3.bf16.msra.mxu1 %v618_v25  ;;  %578 = vmatpush3.bf16.msra.mxu0 %v626_v41 }
  0x1c   :  { %601 = vmatprep.subr.bf16.mxu1 %v640_v2  ;;  %579 = vmatprep.subr.bf16.mxu0 %v640_v2  ;;  %v629_v46 = vld [vmem:[#allocation4 + $0x28] sm:$0xff]  }
  0x1e   :  { %v630_v48 = vld [vmem:[#allocation4 + $0x30] sm:$0xff]  }
  0x1f   :  { %602 = vmatpush3.bf16.msra.mxu1 %v619_v39  ;;  %580 = vmatpush3.bf16.msra.mxu0 %v627_v42  ;;  %v631_v49 = vld [vmem:[#allocation4 + $0x38] sm:$0xff]  }
  0x20   :  { %603 = vmatprep.subr.bf16.mxu1 %v640_v2  ;;  %581 = vmatprep.subr.bf16.mxu0 %v640_v2 }
  0x23   :  { %604 = vmatpush3.bf16.msra.mxu1 %v620_v40  ;;  %582 = vmatpush3.bf16.msra.mxu0 %v628_v44 }
  0x24   :  { %605 = vmatprep.subr.bf16.mxu1 %v640_v2  ;;  %583 = vmatprep.subr.bf16.mxu0 %v640_v2 }
  0x27   :  { %606 = vmatpush3.bf16.msra.mxu1 %v621_v43  ;;  %584 = vmatpush3.bf16.msra.mxu0 %v629_v46 }
  0x28   :  { %607 = vmatprep.subr.bf16.mxu1 %v640_v2  ;;  %585 = vmatprep.subr.bf16.mxu0 %v640_v2 }
  0x2b   :  { %608 = vmatpush3.bf16.msra.mxu1 %v623_v45  ;;  %586 = vmatpush3.bf16.msra.mxu0 %v630_v48 }
  0x2c   :  { %587 = vmatprep.subr.bf16.mxu0 %v640_v2 }
  0x2e   :  { %610 = vmatmul.mubr.bf16.vlgmr.msra.gmra.mrb[0].mxu1 %v625_v47 }
  0x2f   :  { %588 = vmatpush3.bf16.msra.mxu0 %v631_v49 }
  0x32   :  { %590 = vmatmul.mubr.bf16.vlgmr.msra.gmra.mrb[0].mxu0 %v625_v47 }
 0x101   :  { %v435_v51 = vpop.f32.mrb[0].mxu1 }
 0x102   :  { %v485_v52 = vadd.f32 %v552_v50, %v435_v51  ;;  %v611_v53 = vpop.f32.mrb[1].mxu1 }
 0x103   :  { %v438_v54 = vpop.f32.mrb[2].mxu1 }
 0x104   :  { %v553_v55 = vmul.f32 -1.442695, %v485_v52  ;;  %v486_v56 = vadd.f32 %v552_v50, %v438_v54  ;;  %v612_v57 = vpop.f32.mrb[3].mxu1 }
 0x105   :  { %v330_v59 = vpop.f32.mrb[0].mxu0 }
 0x106   :  { %632 = vpow2.f32 %v553_v55  ;;  %v554_v58 = vmul.f32 -1.442695, %v486_v56  ;;  %v591_v60 = vpop.f32.mrb[1].mxu0  ;;  %v477_v4 = vadd.f32 %v551_v3, %v330_v59 }
 0x107   :  { %v333_v61 = vpop.f32.mrb[2].mxu0 }
 0x108   :  { %634 = vpow2.f32 %v554_v58  ;;  %v592_v62 = vpop.f32.mrb[3].mxu0  ;;  %v478_v10 = vadd.f32 %v551_v3, %v333_v61 }
 0x110   :  { %v633_v63 = vpop.eup %632 }
 0x111   :  { %v493_v0 = vadd.f32 1.0, %v633_v63 }
 0x112   :  { %v635_v1 = vpop.eup %634 }
 0x113   :  { %636 = vrcp.f32 %v493_v0  ;;  %v494_v2 = vadd.f32 1.0, %v635_v1 }
 0x115   :  { %638 = vrcp.f32 %v494_v2 }
 0x11d   :  { %v637_v5 = vpop.eup %636 }
 0x11e   :  { %v499_v6 = vmul.f32 %v637_v5, %v485_v52 }
 0x11f   :  { %v639_v7 = vpop.eup %638 }
 0x120   :  { %v500_v8 = vmul.f32 %v639_v7, %v486_v56  ;;  %v501_v9 = vmul.f32 %v499_v6, %v477_v4 }
 0x122   :  { %503 = vst [vmem:[%s800_s4] sm:$0xff] %v501_v9  ;;  %v502_v11 = vmul.f32 %v500_v8, %v478_v10 }
 0x124   :  { %504 = vst [vmem:[%s800_s4 + $0x8] sm:$0xff] %v502_v11 }

</bundles_post_ra>
